<compile_context>
chip_gen: v7x
topology: tpu7x:2x2x1
jax: 0.10.0
libtpu: 0.0.40
codegen_flags: <defaults>
</compile_context>

<pallas_src>
import jax
import jax.numpy as jnp
from jax import lax
from jax.experimental import pallas as pl
from jax.experimental.pallas import tpu as pltpu


def _jaccard_kernel(fi_ref, fj_ref, ci_ref, cj_ref, o_ref):
    # inter[i, j] = <features[i], features[j]> — MXU, f32 accumulation.
    # Contract over the feature axis of both tiles (no explicit transpose).
    inter = lax.dot_general(
        fi_ref[...], fj_ref[...],
        dimension_numbers=(((1,), (1,)), ((), ())),
        preferred_element_type=jnp.float32,
    )
    # denom[i, j] = |A_i| + |A_j| - |A_i ∩ A_j|   ((tm,1)+(1,tn) broadcast).
    denom = ci_ref[...] + cj_ref[...] - inter
    # denom == 0 only when both rows are empty (reference numpy yields nan);
    # emit 0 there so zero-padded rows are harmless.
    jac = jnp.where(denom > 0.0, inter / denom, 0.0)
    o_ref[...] = jac.astype(o_ref.dtype)


def jac_aug_forward(attr_idx, n, d, *, row_tile=None):
    """Pairwise Jaccard similarity matrix Jn of shape (n, n)."""
    # --- sparse -> dense binary feature matrix (plain JAX scatter) ----------
    # TODO(synk): assumes attr_idx has no duplicate (row, col) entries, as is
    # standard for an attribute incidence matrix (torch to_dense would sum).
    rows = attr_idx[0]
    cols = attr_idx[1]
    features = jnp.zeros((n, d), jnp.float32).at[rows, cols].set(1.0)

    counts = jnp.sum(features, axis=1)            # == count_nonzero (binary)

    # --- tiling --------------------------------------------------------------
    if row_tile is None:
        # Lane-dense (multiple of 128) / sublane-aligned tile for real n;
        # tiny n uses a single full-extent block.
        row_tile = n if n <= 256 else 256
    n_pad = ((n + row_tile - 1) // row_tile) * row_tile
    if n_pad != n:
        features = jnp.pad(features, ((0, n_pad - n), (0, 0)))
        counts = jnp.pad(counts, (0, n_pad - n))

    feats_mxu = features.astype(jnp.bfloat16)     # exact for 0/1 values
    counts_col = counts.reshape(n_pad, 1)         # broadcasts over lanes
    counts_row = counts.reshape(1, n_pad)         # broadcasts over sublanes

    grid = (n_pad // row_tile, n_pad // row_tile)

    out = pl.pallas_call(
        _jaccard_kernel,
        out_shape=jax.ShapeDtypeStruct((n_pad, n_pad), jnp.float32),
        grid_spec=pltpu.PrefetchScalarGridSpec(
            num_scalar_prefetch=0,
            grid=grid,
            in_specs=[
                pl.BlockSpec((row_tile, d), lambda i, j: (i, 0)),    # F row tile
                pl.BlockSpec((row_tile, d), lambda i, j: (j, 0)),    # F col tile
                pl.BlockSpec((row_tile, 1), lambda i, j: (i, 0)),    # counts (col vec)
                pl.BlockSpec((1, row_tile), lambda i, j: (0, j)),    # counts (row vec)
            ],
            out_specs=pl.BlockSpec((row_tile, row_tile), lambda i, j: (i, j)),
        ),
        compiler_params=pltpu.CompilerParams(
            dimension_semantics=("parallel", "parallel"),
            # Keep big tiles viable above v5e's 16 MiB scoped-VMEM default
            # while staying well under v7x's 64 MiB physical VMEM.
            vmem_limit_bytes=32 * 1024 * 1024,
        ),
    )(feats_mxu, feats_mxu, counts_col, counts_row)

    return out[:n, :n]


if __name__ == "__main__":
    key = jax.random.PRNGKey(0)
    n, d = 8, 16

    # Deterministic sparse attribute pattern; guarantee every row is nonempty
    # (matches the module's implicit assumption — empty rows give nan in the
    # numpy reference).
    dense_mask = jax.random.bernoulli(key, 0.3, (n, d))
    dense_mask = dense_mask.at[jnp.arange(n), jnp.arange(n) % d].set(True)
    rows, cols = jnp.nonzero(dense_mask)
    attr_idx = jnp.stack([rows, cols]).astype(jnp.int32)   # [2, nnz]

    Jn = jac_aug_forward(attr_idx, n, d)
    jax.block_until_ready(Jn)

    # Plain-JAX reference of the same math.
    F = jnp.zeros((n, d), jnp.float32).at[attr_idx[0], attr_idx[1]].set(1.0)
    c = jnp.sum(F, axis=1)
    inter = F @ F.T
    ref = inter / (c[:, None] + c[None, :] - inter)

    assert Jn.shape == (n, n)
    assert jnp.allclose(Jn, ref, atol=1e-6, rtol=1e-6)
    print("KERNEL_OK")
</pallas_src>

<mosaic_0001>
module attributes {stable_mosaic.version = 11 : i64} {
  func.func @_jaccard_kernel(%arg0: i32, %arg1: i32, %arg2: memref<8x16xbf16, #tpu.memory_space<vmem>>, %arg3: memref<8x16xbf16, #tpu.memory_space<vmem>>, %arg4: memref<8x1xf32, #tpu.memory_space<vmem>>, %arg5: memref<1x8xf32, #tpu.memory_space<vmem>>, %arg6: memref<8x8xf32, #tpu.memory_space<vmem>>) attributes {dimension_semantics = [#tpu.dimension_semantics<parallel>, #tpu.dimension_semantics<parallel>], iteration_bounds = array<i64: 1, 1>, scalar_prefetch = 0 : i64, scratch_operands = 0 : i64, tpu.core_type = #tpu.core_type<tc>, window_params = [{transform_indices = @transform_0, window_bounds = array<i64: 8, 16>}, {transform_indices = @transform_1, window_bounds = array<i64: 8, 16>}, {transform_indices = @transform_2, window_bounds = array<i64: 8, 1>}, {transform_indices = @transform_3, window_bounds = array<i64: 1, 8>}, {transform_indices = @transform_4, window_bounds = array<i64: 8, 8>}]} {
    %c0 = arith.constant 0 : index
    %c0_0 = arith.constant 0 : index
    %0 = vector.load %arg2[%c0, %c0_0] : memref<8x16xbf16, #tpu.memory_space<vmem>>, vector<8x16xbf16>
    %c0_1 = arith.constant 0 : index
    %c0_2 = arith.constant 0 : index
    %1 = vector.load %arg3[%c0_1, %c0_2] : memref<8x16xbf16, #tpu.memory_space<vmem>>, vector<8x16xbf16>
    %cst = arith.constant dense<0.000000e+00> : vector<8x8xf32>
    %2 = tpu.matmul %0, %1, %cst {dimension_numbers = #tpu.dot_dimension_numbers<[1], [1], [0], [0], [0, 0, 1, 0], [], []>} : vector<8x16xbf16>, vector<8x16xbf16>, vector<8x8xf32> -> vector<8x8xf32>
    %c0_3 = arith.constant 0 : index
    %c0_4 = arith.constant 0 : index
    %3 = vector.load %arg4[%c0_3, %c0_4] : memref<8x1xf32, #tpu.memory_space<vmem>>, vector<8x1xf32>
    %c0_5 = arith.constant 0 : index
    %c0_6 = arith.constant 0 : index
    %4 = vector.load %arg5[%c0_5, %c0_6] : memref<1x8xf32, #tpu.memory_space<vmem>>, vector<1x8xf32>
    %5 = vector.broadcast %3 : vector<8x1xf32> to vector<8x8xf32>
    %6 = vector.broadcast %4 : vector<1x8xf32> to vector<8x8xf32>
    %7 = arith.addf %5, %6 : vector<8x8xf32>
    %8 = arith.subf %7, %2 : vector<8x8xf32>
    %cst_7 = arith.constant 0.000000e+00 : f32
    %9 = vector.broadcast %cst_7 : f32 to vector<8x8xf32>
    %10 = arith.cmpf ogt, %8, %9 : vector<8x8xf32>
    %11 = arith.divf %2, %8 : vector<8x8xf32>
    %cst_8 = arith.constant 0.000000e+00 : f32
    %12 = vector.broadcast %cst_8 : f32 to vector<8x8xf32>
    %13 = arith.select %10, %11, %12 : vector<8x8xi1>, vector<8x8xf32>
    %c0_9 = arith.constant 0 : index
    %c0_10 = arith.constant 0 : index
    %14 = vector.load %arg6[%c0_9, %c0_10] : memref<8x8xf32, #tpu.memory_space<vmem>>, vector<8x8xf32>
    tpu.vector_store %arg6[%c0_9, %c0_10], %13 {strides = array<i32>} : memref<8x8xf32, #tpu.memory_space<vmem>>, vector<8x8xf32>,
    return
  }
  func.func @transform_0(%arg0: i32, %arg1: i32) -> (i32, i32) {
    %c0_i32 = arith.constant 0 : i32
    %c0_i32_0 = arith.constant 0 : i32
    return %arg0, %c0_i32 : i32, i32
  }
  func.func @transform_1(%arg0: i32, %arg1: i32) -> (i32, i32) {
    %c0_i32 = arith.constant 0 : i32
    %c0_i32_0 = arith.constant 0 : i32
    return %arg1, %c0_i32 : i32, i32
  }
  func.func @transform_2(%arg0: i32, %arg1: i32) -> (i32, i32) {
    %c0_i32 = arith.constant 0 : i32
    %c0_i32_0 = arith.constant 0 : i32
    return %arg0, %c0_i32 : i32, i32
  }
  func.func @transform_3(%arg0: i32, %arg1: i32) -> (i32, i32) {
    %c0_i32 = arith.constant 0 : i32
    %c0_i32_0 = arith.constant 0 : i32
    return %c0_i32, %arg1 : i32, i32
  }
  func.func @transform_4(%arg0: i32, %arg1: i32) -> (i32, i32) {
    %c0_i32 = arith.constant 0 : i32
    return %arg0, %arg1 : i32, i32
  }
}

</mosaic_0001>

<bundles_post_ra>
// kernel: tpu_custom_call.1
= control target key start
LH: loop header
LB: loop body
LE: loop exit
PB: predicated region body
PF: predicated region fallthrough
CT: control target
= control target key end

     0   :  { %vm21_vm0 = vcmask 130048   ;;  %v144_v1 = vmov 0.0   ;;  %vm145_vm1 = vmmov 0   ;;  %v146_v4 = vmov 0   ;;  %s197_s0 = inlined_call_operand.vmem [shape: bf16[8,16], index: 0, kind: input, shape index: {}]   ;;  %s198_s1 = inlined_call_operand.vmem [shape: bf16[8,16], index: 1, kind: input, shape index: {}]   ;;  %s199_s2 = inlined_call_operand.vmem [shape: f32[8,1], index: 2, kind: input, shape index: {}]   ;;  %s200_s3 = inlined_call_operand.vmem [shape: f32[1,8], index: 3, kind: input, shape index: {}]   ;;  %s201_s4 = inlined_call_operand.hbm [shape: f32[8,8], index: 4, kind: output, shape index: {}]  }
   0x1   :  { %v20_v0 = vld [vmem:[%s198_s1] sm:$0xf]  ;;  %107 = vmatprep.subr.bf16.mxu0 %v144_v1  ;;  %109 = vmatprep.mubr.msk.bf16.mxu0 %vm145_vm1, %v144_v1 }
   0x2   :  { %v26_v2 = vsel %vm21_vm0, %v20_v0, 0  ;;  %v68_v3 = vld [vmem:[%s199_s2] sm:$0xff]  ;;  %117 = vset.pattern.permute.xlu0 %v146_v4 }
   0x3   :  { %108 = vmatpush3.bf16.xpose.msra.mxu0 %v26_v2 }
   0x4   :  { %9 = vsyncpa [#allocation3], 0  ;;  %72 = vperm.xlu0 %117, %v68_v3   ;;  %v19_v5 = vld [vmem:[%s197_s0] sm:$0xf]  ;;  %s147_s2 = smov [#allocation2]   ;;  %vm87_vm2 = vcmask 64512  }
   0x5   :  { %v104_v6 = vld [vmem:[%s200_s3] ss:$0 sm:$0xff]  ;;  %s95_s22 = sshll.u32 %s147_s2, 4  ;;  %s96_s22 = int_to_ptr.vmem [resolvable:$true] %s95_s22 }
   0x6   :  { %s120_s0 = scalar_lea.vmem %s96_s22, 128  ;;  %p125_p1 = scmp.lt.s32.totalorder %s96_s22, %s96_s22 }
   0x7   :  { %p121_p0 = scmp.ne.s32.totalorder %s96_s22, %s120_s0  ;;  %p126_p2 = scmp.lt.s32.totalorder %s120_s0, %s120_s0 }
   0x9   :  { %p127_p3 = por %p126_p2, %p125_p1 }
   0xa   :  { %110 = vmatmul.mubr.msk.bf16.vlgmr.msra.gmra.mrb[0].mxu0 %vm21_vm0, %v19_v5 }
   0xb   :  { %p128_p4 = pnand %p127_p3, %p121_p0 }
  0x83   :  { %v73_v7 = vpop.permute.xlu0 %72 }
  0x84   :  { %v81_v8 = vadd.f32 %v104_v6, %v73_v7 }
  0xdd   :  { %v62_v9 = vpop.f32.mrb[0].mxu0 }
  0xde   :  { %v82_v10 = vsub.f32 %v81_v8, %v62_v9  ;;  %v111_v11 = vpop.f32.mrb[1].mxu0 }
  0xdf   :  { %v65_v12 = vpop.f32.mrb[2].mxu0 }
  0xe0   :  { %118 = vrcp.f32 %v82_v10  ;;  %v112_v13 = vpop.f32.mrb[3].mxu0  ;;  %vm83_vm3 = vcmp.gt.f32.partialorder %v82_v10, 0.0 }
  0xea   :  { %v119_v14 = vpop.eup %118 }
  0xeb   :  { %v85_v15 = vmul.f32 %v119_v14, %v62_v9 }
  0xed   :  { %v86_v16 = vsel %vm83_vm3, %v85_v15, 0.0 }
  0xee   :  { %88 = vst.msk [vmem:[#allocation2] sm:$0xff] %vm87_vm2, %v86_v16 }
  0xef   :  { %131 = shalt.err (!%p128_p4)
}
  0xf0   :  { %s132_s24 = scalar_lea.hbm %s201_s4, 128 }
  0xf1   :  { %p133_p5 = scmp.ne.s32.totalorder %s201_s4, %s132_s24  ;;  %p136_p6 = scmp.lt.u32.totalorder %s132_s24, %s201_s4 }
  0xf3   :  { %p138_p7 = pnand %p136_p6, %p133_p5 }
  0xf5   :  { %141 = shalt.err (!%p138_p7)
}
  0xf6   :  { %98 = dma.vmem_to_hbm [thread:$0]  %s96_s22, 128, %s201_s4, [#allocation3]  }
  0xf7   :  { %142 = dma.done.wait [#allocation3], 128  }
  0xf8   :  { %143 = vsyncadd [#allocation3], 4294967168 }
  0xf9   :  { %102 = vsyncpa [#allocation3], 1 }

</bundles_post_ra>
